<compile_context>
chip_gen: v5e
topology: v5e:2x2
jax: 0.10.0
libtpu: 0.0.40
codegen_flags: <defaults>
</compile_context>

<pallas_src>
import functools

import jax
import jax.numpy as jnp
from jax.experimental import pallas as pl
from jax.experimental.pallas import tpu as pltpu


def _clamp_kernel(x_ref, o_ref, *, scale, offset):
    x = x_ref[...].astype(jnp.float32)
    # sigmoid(x) = 1 / (1 + exp(-x)); exp and approx reciprocal both run on the
    # EUP slot, leaving the VALU free for the fused multiply-add.
    s = pl.reciprocal(1.0 + jnp.exp(-x), approx=True)
    o_ref[...] = (s * scale + offset).astype(o_ref.dtype)


def _round_up8(r):
    return -(-r // 8) * 8


def clamp_forward(x, cmin, cmax, *, lanes=1024, block_rows=512):
    """Pallas implementation of Clamp.forward.  x: any shape, any float dtype."""
    orig_shape = x.shape
    dtype = x.dtype
    n = x.size

    scale = float(cmax) - float(cmin)
    offset = float(cmin)

    # ---- layout: lane-dense 2D slab ---------------------------------------
    tail = 0
    if n % lanes == 0:                          # fast path: free reshape
        x2d = jnp.reshape(x, (n // lanes, lanes))
    elif n % 128 == 0:                          # still a free reshape, 128 lanes
        lanes = 128
        x2d = jnp.reshape(x, (n // 128, 128))
    else:                                       # ragged: pad ONLY to 128-lane boundary
        lanes = 128
        rows_ = pl.cdiv(n, 128)
        tail = rows_ * 128 - n                  # < 128 elements of padding
        x2d = jnp.reshape(jnp.pad(jnp.reshape(x, (-1,)), (0, tail)), (rows_, 128))
    rows = x2d.shape[0]

    # ---- tile sizing --------------------------------------------------------
    # Default tile: 512 x 1024 f32 = 2 MiB.  Double-buffered in+out = 8 MiB,
    # which fits every generation's default scoped-VMEM limit (incl. v5e's
    # 16 MiB).  For small inputs shrink the tile; keep the grid >= 2 steps when
    # possible so v7x megacore (dimension_semantics="parallel") has work on
    # both TensorCores.  Ragged final blocks are masked by Pallas.
    if rows <= 8:
        br = rows                               # single whole-slab block (equals full dim)
    else:
        br = min(block_rows, max(8, _round_up8(-(-rows // 2))))
    grid = (pl.cdiv(rows, br),)

    kernel = functools.partial(_clamp_kernel, scale=scale, offset=offset)

    out2d = pl.pallas_call(
        kernel,
        out_shape=jax.ShapeDtypeStruct((rows, lanes), dtype),
        grid_spec=pltpu.PrefetchScalarGridSpec(
            num_scalar_prefetch=0,
            grid=grid,
            in_specs=[pl.BlockSpec((br, lanes), lambda i: (i, 0))],
            out_specs=pl.BlockSpec((br, lanes), lambda i: (i, 0)),
        ),
        compiler_params=pltpu.CompilerParams(
            dimension_semantics=("parallel",)),
        cost_estimate=pl.CostEstimate(
            flops=4 * n,
            transcendentals=n,
            bytes_accessed=2 * n * x.dtype.itemsize),
    )(x2d)

    if tail:
        # uncommon ragged path: drop the (<128-element) pad region
        return jnp.reshape(jnp.reshape(out2d, (-1,))[:n], orig_shape)
    return jnp.reshape(out2d, orig_shape)


def _reference(x, cmin, cmax):
    return jax.nn.sigmoid(x) * (cmax - cmin) + cmin


if __name__ == "__main__":
    key = jax.random.PRNGKey(0)
    cmin, cmax = -1.0, 1.0  # deterministic module "parameters"

    # NCHW-style input (fast path: size divisible by 1024 lanes)
    x = jax.random.normal(key, (2, 4, 16, 16), dtype=jnp.float32)
    y = jax.block_until_ready(clamp_forward(x, cmin, cmax))
    # approx EUP reciprocal -> allow a few-ulp fast-math tolerance
    assert jnp.allclose(y, _reference(x, cmin, cmax), atol=5e-3, rtol=5e-3), \
        "mismatch vs reference (fast path)"

    # larger divisible input exercising a multi-step grid
    k1, k2 = jax.random.split(key)
    x_big = jax.random.normal(k1, (4, 8, 32, 32), dtype=jnp.float32)
    y_big = jax.block_until_ready(clamp_forward(x_big, cmin, cmax))
    assert jnp.allclose(y_big, _reference(x_big, cmin, cmax), atol=5e-3, rtol=5e-3), \
        "mismatch vs reference (multi-block path)"

    # ragged input exercising the lane-boundary-pad fallback
    x_rag = jax.random.normal(k2, (3, 5, 7), dtype=jnp.float32)
    y_rag = jax.block_until_ready(clamp_forward(x_rag, cmin, cmax))
    assert jnp.allclose(y_rag, _reference(x_rag, cmin, cmax), atol=5e-3, rtol=5e-3), \
        "mismatch vs reference (ragged path)"

    print("KERNEL_OK")
</pallas_src>

<mosaic_0001>
module attributes {stable_mosaic.version = 11 : i64} {
  func.func @_clamp_kernel(%arg0: i32, %arg1: memref<2x1024xf32, #tpu.memory_space<vmem>>, %arg2: memref<2x1024xf32, #tpu.memory_space<vmem>>) attributes {dimension_semantics = [#tpu.dimension_semantics<parallel>], iteration_bounds = array<i64: 1>, scalar_prefetch = 0 : i64, scratch_operands = 0 : i64, tpu.core_type = #tpu.core_type<tc>, window_params = [{transform_indices = @transform_0, window_bounds = array<i64: 2, 1024>}, {transform_indices = @transform_1, window_bounds = array<i64: 2, 1024>}]} {
    %c0 = arith.constant 0 : index
    %c0_0 = arith.constant 0 : index
    %0 = vector.load %arg1[%c0, %c0_0] : memref<2x1024xf32, #tpu.memory_space<vmem>>, vector<2x1024xf32>
    %cst = arith.constant 0.000000e+00 : f32
    %1 = vector.broadcast %cst : f32 to vector<2x1024xf32>
    %2 = arith.subf %1, %0 : vector<2x1024xf32>
    %3 = math.exp %2 : vector<2x1024xf32>
    %cst_1 = arith.constant 1.000000e+00 : f32
    %4 = vector.broadcast %cst_1 : f32 to vector<2x1024xf32>
    %5 = arith.addf %4, %3 : vector<2x1024xf32>
    %6 = tpu.reciprocal %5 {approx = true} : vector<2x1024xf32> -> vector<2x1024xf32>
    %cst_2 = arith.constant 2.000000e+00 : f32
    %7 = vector.broadcast %cst_2 : f32 to vector<2x1024xf32>
    %8 = arith.mulf %6, %7 : vector<2x1024xf32>
    %cst_3 = arith.constant -1.000000e+00 : f32
    %9 = vector.broadcast %cst_3 : f32 to vector<2x1024xf32>
    %10 = arith.addf %8, %9 : vector<2x1024xf32>
    %c0_4 = arith.constant 0 : index
    %c0_5 = arith.constant 0 : index
    %11 = vector.load %arg2[%c0_4, %c0_5] : memref<2x1024xf32, #tpu.memory_space<vmem>>, vector<2x1024xf32>
    tpu.vector_store %arg2[%c0_4, %c0_5], %10 {strides = array<i32>} : memref<2x1024xf32, #tpu.memory_space<vmem>>, vector<2x1024xf32>,
    return
  }
  func.func @transform_0(%arg0: i32) -> (i32, i32) {
    %c0_i32 = arith.constant 0 : i32
    %c0_i32_0 = arith.constant 0 : i32
    return %arg0, %c0_i32 : i32, i32
  }
  func.func @transform_1(%arg0: i32) -> (i32, i32) {
    %c0_i32 = arith.constant 0 : i32
    %c0_i32_0 = arith.constant 0 : i32
    return %arg0, %c0_i32 : i32, i32
  }
}

</mosaic_0001>

<bundles_post_ra>
// kernel: tpu_custom_call.1
= control target key start
LH: loop header
LB: loop body
LE: loop exit
PB: predicated region body
PF: predicated region fallthrough
CT: control target
= control target key end

     0   :  { %6 = vsyncpa [#allocation3], 0  ;;  %s138_s0 = inlined_call_operand.hbm [shape: f32[2,1024], index: 0, kind: input, shape index: {}]   ;;  %s139_s1 = inlined_call_operand.hbm [shape: f32[2,1024], index: 1, kind: output, shape index: {}]  }
   0x1   :  { %7 = vsyncpa [#allocation4], 0  ;;  %s13_s8 = sshll.u32 %s138_s0, 4  ;;  %s120_s9 = smov [#allocation2]   ;;  %s14_s8 = int_to_ptr.hbm [resolvable:$true] %s13_s8 }
   0x2   :  { %s15_s10 = sshll.u32 %s120_s9, 4  ;;  %s16_s10 = int_to_ptr.vmem [resolvable:$true] %s15_s10 }
   0x3   :  { %18 = dma.hbm_to_vmem [thread:$0]  %s14_s8, 256, %s16_s10, [#allocation3]  }
   0x4   :  { %116 = dma.done.wait [#allocation3], 256  }
   0x5   :  { %117 = vsyncadd [#allocation3], 4294967040  ;;  %v23_v0 = vld [vmem:[#allocation2] sm:$0xff]  ;;  %v24_v1 = vld [vmem:[#allocation2 + $0x8] sm:$0xff]  ;;  %s121_s0 = smov [#allocation5]   ;;  %s48_s14 = sshll.u32 %s139_s1, 4  ;;  %s49_s14 = int_to_ptr.hbm [resolvable:$true] %s48_s14 }
   0x6   :  { %v25_v2 = vsub.f32 0.0, %v23_v0  ;;  %v26_v3 = vsub.f32 0.0, %v24_v1  ;;  %s46_s11 = sshll.u32 %s121_s0, 4  ;;  %s47_s11 = int_to_ptr.vmem [resolvable:$true] %s46_s11 }
   0x8   :  { %v27_v4 = vmul.f32 1.442695, %v25_v2  ;;  %v29_v5 = vmul.f32 1.442695, %v26_v3 }
   0xa   :  { %60 = vpow2.f32 %v27_v4 }
   0xb   :  { %62 = vpow2.f32 %v29_v5 }
  0x10   :  { %v61_v6 = vpop.eup %60 }
  0x11   :  { %v63_v7 = vpop.eup %62  ;;  %v31_v8 = vadd.f32 1.0, %v61_v6 }
  0x12   :  { %v32_v9 = vadd.f32 1.0, %v63_v7 }
  0x13   :  { %64 = vrcp.f32 %v31_v8 }
  0x14   :  { %66 = vrcp.f32 %v32_v9 }
  0x19   :  { %v65_v10 = vpop.eup %64 }
  0x1a   :  { %v67_v11 = vpop.eup %66  ;;  %v35_v12 = vmul.f32 2.0, %v65_v10 }
  0x1b   :  { %v36_v13 = vmul.f32 2.0, %v67_v11 }
  0x1c   :  { %v37_v14 = vadd.f32 -1.0, %v35_v12 }
  0x1d   :  { %v38_v15 = vadd.f32 -1.0, %v36_v13 }
  0x1e   :  { %39 = vst [vmem:[#allocation5] sm:$0xff] %v37_v14 }
  0x1f   :  { %40 = vst [vmem:[#allocation5 + $0x8] sm:$0xff] %v38_v15 }
  0x20   :  { %51 = dma.vmem_to_hbm [thread:$0]  %s47_s11, 256, %s49_s14, [#allocation4]  }
  0x21   :  { %118 = dma.done.wait [#allocation4], 256  }
  0x22   :  { %119 = vsyncadd [#allocation4], 4294967040 }
  0x23   :  { %56 = vsyncpa [#allocation3], 1 }
  0x24   :  { %57 = vsyncpa [#allocation4], 1 }

</bundles_post_ra>
